<compile_context>
chip_gen: v7x
topology: tpu7x:2x2x1
jax: 0.10.0
libtpu: 0.0.40
codegen_flags: <defaults>
</compile_context>

<pallas_src>
import jax
import jax.numpy as jnp
from jax.experimental import pallas as pl
from jax.experimental.pallas import tpu as pltpu


def _make_upsample_kernel(expand: int, pool: int):
    """Kernel on one (row-tile, length-tile) block: (tr, tl) -> (tr//expand, tl*pool)."""
    inv = 1.0 / float(expand)

    def kernel(x_ref, o_ref):
        x = x_ref[...]                      # (tr, tl) block, original dtype
        g = o_ref.shape[0]                  # tr // expand
        tl = x.shape[-1]

        if expand > 1:
            # Group-mean over `expand` consecutive rows ('(d e) l -> d l', mean):
            # reshape + sum in f32, scaled by a compile-time constant 1/expand.
            xg = x.reshape(g, expand, tl).astype(jnp.float32)
            m = jnp.sum(xg, axis=1) * inv
        else:
            m = x

        if pool > 1:
            # Consecutive repeat along length ('l -> (l e)'): broadcast + reshape keeps the
            # output store a full lane-dense (g, tl*pool) slab.
            m = jnp.broadcast_to(m[:, :, None], (g, tl, pool)).reshape(g, tl * pool)

        o_ref[...] = m.astype(o_ref.dtype)

    return kernel


def _choose_tiles(R: int, L: int, expand: int, pool: int, dsize: int):
    """Pick (row_tile, length_tile) for the flattened (R, L) -> (R//expand, L*pool) stream.

    Policy: keep the lane tile long (>= 512 or full L when L <= 2048) and shrink the ROW tile
    against the VMEM budget; row tile is a multiple of 8*expand so channel groups never split
    and both in/out blocks stay sublane-dense.  Edge blocks are handled by cdiv + padding.
    """
    row_unit = 8 * expand
    budget = 12 * 1024 * 1024  # block-buffer budget (double-buffered in/out + f32 temps)

    def block_bytes(tr, tl):
        g = max(tr // expand, 1)
        b = 2 * tr * tl * dsize                  # double-buffered input block
        b += 2 * g * tl * pool * dsize           # double-buffered output block
        if expand > 1:
            b += g * max(expand, 8) * tl * 4     # f32 (g, expand, tl) reshape (sublane-padded)
            b += g * tl * 4                      # f32 mean
        if pool > 1:
            b += g * tl * pool * 4               # f32 repeat intermediate
        return b

    # Lane tile: full L when small, else a multiple of 128; shrink only if even the minimal
    # row tile cannot fit (extreme expand/pool).
    tl = L if L <= 2048 else 2048
    while L > 2048 and tl > 128 and block_bytes(row_unit, tl) > budget:
        tl //= 2

    # Row tile: grow in multiples of row_unit under the budget, capped at ~1024 rows.
    r_full = -(-R // row_unit) * row_unit
    row_cap = max(row_unit, (1024 // row_unit) * row_unit)
    tr = row_unit
    while (tr + row_unit <= min(r_full, row_cap)
           and block_bytes(tr + row_unit, tl) <= budget):
        tr += row_unit

    if tr >= R:
        tr = R  # single row block: block dim == full array dim (always layout-legal)
        # v7x has 2 TensorCores sharing HBM; if everything collapsed into one block but there
        # is enough work, split rows so both cores get a block (no-op on tiny inputs/v5e/v6e).
        if tl == L and R >= 2 * row_unit:
            tr = (-(-R // (2 * row_unit))) * row_unit

    return tr, tl


def upsample_pallas(x, pool: int = 1, expand: int = 1):
    """x: (B, C, L) float array (transposed layout). Returns (B, C // expand, L * pool)."""
    B, C, L = x.shape
    assert C % expand == 0, "d_input must be divisible by expand"
    assert jnp.issubdtype(x.dtype, jnp.floating), "float inputs only (mean computed in f32)"
    d_out = C // expand
    l_out = L * pool

    if pool == 1 and expand == 1:
        return x  # identity: skip the HBM round trip entirely

    dsize = jnp.dtype(x.dtype).itemsize

    # Flatten (B, C, L) -> (B*C, L): free (contiguous).  Groups of `expand` consecutive rows
    # stay intact, so the group-mean is a pure row-block reduction and small-C shapes still
    # fill >= 8 sublanes per block.
    R = B * C
    R_out = B * d_out
    x2 = x.reshape(R, L)

    tr, tl = _choose_tiles(R, L, expand, pool, dsize)
    tr_out = tr // expand
    n_r = pl.cdiv(R, tr)
    n_l = pl.cdiv(L, tl)

    kernel = _make_upsample_kernel(expand, pool)

    cost = pl.CostEstimate(
        flops=R * L,                                          # adds for the group mean
        transcendentals=0,
        bytes_accessed=R * L * dsize + R_out * l_out * dsize,  # pure streaming op
    )

    out2 = pl.pallas_call(
        kernel,
        out_shape=jax.ShapeDtypeStruct((R_out, l_out), x.dtype),
        grid=(n_r, n_l),
        in_specs=[pl.BlockSpec((tr, tl), lambda r, l: (r, l))],
        out_specs=pl.BlockSpec((tr_out, tl * pool), lambda r, l: (r, l)),
        compiler_params=pltpu.CompilerParams(
            dimension_semantics=("parallel", "parallel"),
            vmem_limit_bytes=40 << 20,
        ),
        cost_estimate=cost,
    )(x2)

    return out2.reshape(B, d_out, l_out)


class UpSample:
    """JAX/Pallas port of the PyTorch UpSample module (transposed=True path)."""

    def __init__(self, d_input, pool=1, expand=1, transposed=True):
        self.d_input = d_input
        self.pool = pool
        self.expand = expand
        self.transposed = transposed
        # TODO(synk): non-transposed (..., l, d) path not wired up; module default is transposed=True.
        assert transposed, "kernel implements the default transposed=True layout (B, C, L)"

    def __call__(self, x):
        if x is None:
            return None
        return upsample_pallas(x, pool=self.pool, expand=self.expand)

    @property
    def d_output(self):
        return self.d_input // self.expand


def _reference(x, pool, expand):
    """Pure-JAX reference mirroring einops reduce/repeat semantics."""
    B, C, L = x.shape
    y = x.astype(jnp.float32).reshape(B, C // expand, expand, L).mean(axis=2)
    y = jnp.repeat(y, pool, axis=-1)
    return y.astype(x.dtype)


if __name__ == "__main__":
    key = jax.random.PRNGKey(0)
    k1, k2, k3 = jax.random.split(key, 3)

    # Case 1: small shape consistent with the module: batch=2, d_input=8 channels, length=16.
    B, d_input, L = 2, 8, 16
    pool, expand = 2, 2
    x = jax.random.normal(k1, (B, d_input, L), dtype=jnp.float32)

    mod = UpSample(d_input, pool=pool, expand=expand, transposed=True)
    y = mod(x)
    jax.block_until_ready(y)

    ref = _reference(x, pool, expand)
    assert y.shape == (B, d_input // expand, L * pool), y.shape
    assert y.dtype == x.dtype
    assert jnp.allclose(y, ref, atol=1e-5, rtol=1e-5)

    # Case 2: expand=4 with a 128-multiple length.
    x2 = jax.random.normal(k2, (2, 16, 256), dtype=jnp.float32)
    y2 = upsample_pallas(x2, pool=2, expand=4)
    jax.block_until_ready(y2)
    ref2 = _reference(x2, 2, 4)
    assert y2.shape == (2, 4, 512), y2.shape
    assert jnp.allclose(y2, ref2, atol=1e-5, rtol=1e-5)

    # Case 3: pure repeat (expand=1) with a non-128-multiple length.
    x3 = jax.random.normal(k3, (2, 4, 16), dtype=jnp.float32)
    y3 = upsample_pallas(x3, pool=3, expand=1)
    jax.block_until_ready(y3)
    ref3 = _reference(x3, 3, 1)
    assert y3.shape == (2, 4, 48), y3.shape
    assert jnp.allclose(y3, ref3, atol=1e-5, rtol=1e-5)

    print("KERNEL_OK")
</pallas_src>

<mosaic_0001>
module attributes {stable_mosaic.version = 11 : i64} {
  func.func @kernel(%arg0: i32, %arg1: i32, %arg2: memref<16x16xf32, #tpu.memory_space<vmem>>, %arg3: memref<8x32xf32, #tpu.memory_space<vmem>>) attributes {dimension_semantics = [#tpu.dimension_semantics<parallel>, #tpu.dimension_semantics<parallel>], iteration_bounds = array<i64: 1, 1>, scalar_prefetch = 0 : i64, scratch_operands = 0 : i64, tpu.core_type = #tpu.core_type<tc>, window_params = [{transform_indices = @transform_0, window_bounds = array<i64: 16, 16>}, {transform_indices = @transform_1, window_bounds = array<i64: 8, 32>}]} {
    %c0 = arith.constant 0 : index
    %c0_0 = arith.constant 0 : index
    %0 = vector.load %arg2[%c0, %c0_0] : memref<16x16xf32, #tpu.memory_space<vmem>>, vector<16x16xf32>
    %1 = vector.shape_cast %0 : vector<16x16xf32> to vector<8x2x16xf32>
    %cst = arith.constant dense<0.000000e+00> : vector<8x16xf32>
    %2 = vector.multi_reduction <add>, %1, %cst [1] : vector<8x2x16xf32> to vector<8x16xf32>
    %cst_1 = arith.constant 5.000000e-01 : f32
    %3 = vector.broadcast %cst_1 : f32 to vector<8x16xf32>
    %4 = arith.mulf %2, %3 : vector<8x16xf32>
    %5 = vector.shape_cast %4 : vector<8x16xf32> to vector<8x16x1xf32>
    %6 = vector.shape_cast %5 : vector<8x16x1xf32> to vector<8x16x1xf32>
    %7 = vector.broadcast %6 : vector<8x16x1xf32> to vector<8x16x2xf32>
    %8 = vector.shape_cast %7 : vector<8x16x2xf32> to vector<8x32xf32>
    %c0_2 = arith.constant 0 : index
    %c0_3 = arith.constant 0 : index
    %9 = vector.load %arg3[%c0_2, %c0_3] : memref<8x32xf32, #tpu.memory_space<vmem>>, vector<8x32xf32>
    tpu.vector_store %arg3[%c0_2, %c0_3], %8 {strides = array<i32>} : memref<8x32xf32, #tpu.memory_space<vmem>>, vector<8x32xf32>,
    return
  }
  func.func @transform_0(%arg0: i32, %arg1: i32) -> (i32, i32) {
    %c0_i32 = arith.constant 0 : i32
    return %arg0, %arg1 : i32, i32
  }
  func.func @transform_1(%arg0: i32, %arg1: i32) -> (i32, i32) {
    %c0_i32 = arith.constant 0 : i32
    return %arg0, %arg1 : i32, i32
  }
}

</mosaic_0001>

<bundles_post_ra>
// kernel: tpu_custom_call.1
= control target key start
LH: loop header
LB: loop body
LE: loop exit
PB: predicated region body
PF: predicated region fallthrough
CT: control target
= control target key end

     0   :  { %6 = vsyncpa [#allocation3], 0  ;;  %s778_s0 = inlined_call_operand.hbm [shape: f32[16,16], index: 0, kind: input, shape index: {}]   ;;  %s779_s1 = inlined_call_operand.hbm [shape: f32[8,32], index: 1, kind: output, shape index: {}]  }
   0x1   :  { %7 = vsyncpa [#allocation4], 0  ;;  %s639_s6 = smov [#allocation2]   ;;  %s591_s10 = scalar_lea.hbm %s778_s0, 256 }
   0x2   :  { %s13_s7 = sshll.u32 %s639_s6, 4  ;;  %p592_p0 = scmp.ne.s32.totalorder %s778_s0, %s591_s10  ;;  %s14_s7 = int_to_ptr.vmem [resolvable:$true] %s13_s7 }
   0x3   :  { %p595_p1 = scmp.lt.u32.totalorder %s591_s10, %s778_s0 }
   0x5   :  { %p597_p2 = pnand %p595_p1, %p592_p0 }
   0x7   :  { %600 = shalt.err (!%p597_p2)
}
   0x8   :  { %s601_s15 = scalar_lea.vmem %s14_s7, 256  ;;  %p606_p4 = scmp.lt.s32.totalorder %s14_s7, %s14_s7 }
   0x9   :  { %p602_p3 = scmp.ne.s32.totalorder %s14_s7, %s601_s15  ;;  %p607_p5 = scmp.lt.s32.totalorder %s601_s15, %s601_s15 }
   0xb   :  { %p608_p6 = por %p607_p5, %p606_p4 }
   0xd   :  { %p609_p7 = pnand %p608_p6, %p602_p3 }
   0xf   :  { %612 = shalt.err (!%p609_p7)
}
  0x10   :  { %s640_s16 = smov 128   ;;  %s641_s17 = smov 8  }
  0x11   :  { %19 = dma.hbm_to_vmem [thread:$0]  %s778_s0, 256, %s14_s7, [#allocation3], %s640_s16, %s640_s16, %s641_s17  }
  0x12   :  { %635 = dma.done.wait [#allocation3], 256  }
  0x13   :  { %636 = vsyncadd [#allocation3], 4294967040  ;;  %v31_v0 = vlaneseq  ;;  %v642_v1 = vmov 1983009808   ;;  %v23_v6 = vld [vmem:[#allocation2] sm:$0xff]  ;;  %vm69_vm0 = vcmask 123904  }
  0x14   :  { %v29_v2 = vunpack.c.l.s4 %v642_v1  ;;  %v24_v7 = vld [vmem:[#allocation2 + $0x8] sm:$0xff]  ;;  %v27_v9 = vcombine.high %v23_v6, %v23_v6  ;;  %s644_s0 = smov 4   ;;  %s645_s20 = smov 2   ;;  %vm522_vm1 = vcmask 15360   ;;  %vm524_vm2 = vcmask 31744  }
  0x15   :  { %v682_v3 = vshrl.u32 %v31_v0, 7  ;;  %v44_v11 = vcombine.high %v24_v7, %v24_v7  ;;  %s646_s21 = smov 6   ;;  %s647_s22 = smov 12   ;;  %vm526_vm3 = vcmask 48128   ;;  %vm528_vm4 = vcmask 64512  }
  0x16   :  { %v30_v4 = vunpack.c.0.s8 %v29_v2  ;;  %s648_s23 = smov 10   ;;  %s649_s24 = smov 14   ;;  %vm530_vm5 = vcmask 80896   ;;  %vm532_vm6 = vcmask 97280   ;;  %vm534_vm7 = vcmask 113664  }
  0x17   :  { %s650_s25 = smov 16   ;;  %s651_s26 = smov 18   ;;  %vm536_vm8 = vcmask 130048   ;;  %vm538_vm9 = vcmask 146432   ;;  %vm540_vm10 = vcmask 162816   ;;  %vm542_vm11 = vcmask 179200  }
  0x18   :  { %v685_v5 = vsub.s32 %v30_v4, %v682_v3  ;;  %s652_s27 = smov 20   ;;  %s653_s28 = smov 22   ;;  %vm544_vm12 = vcmask 195584   ;;  %vm546_vm13 = vcmask 211968   ;;  %vm548_vm14 = vcmask 228352  }
  0x19   :  { %s654_s29 = smov 24   ;;  %s655_s30 = smov 26   ;;  %vm550_vm15 = vcmask 244736  }
  0x1a   :  { %v34_v8 = vrot.slane %v23_v6, %v685_v5  ;;  %v51_v10 = vrot.slane %v24_v7, %v685_v5  ;;  %v41_v13 = vrot.slane %v27_v9, %v685_v5  ;;  %v58_v19 = vrot.slane %v44_v11, %v685_v5  ;;  %s656_s2 = smov 28   ;;  %s657_s3 = smov 30  }
  0x1b   :  { %s658_s4 = smov [#allocation5]  }
  0x1c   :  { %v70_v12 = vsel %vm69_vm0, %v34_v8, 0.0  ;;  %v98_v14 = vsel %vm69_vm0, %v51_v10, 0.0  ;;  %v59_v15 = vcombine.high %v51_v10, %v51_v10  ;;  %v42_v18 = vcombine.high %v34_v8, %v34_v8  ;;  %s560_s5 = sshll.u32 %s658_s4, 4  ;;  %s561_s5 = int_to_ptr.vmem [resolvable:$true] %s560_s5 }
  0x1d   :  { %v71_v16 = vrot.slane %v70_v12, 4  ;;  %v99_v17 = vrot.slane %v98_v14, 4  ;;  %v84_v20 = vsel %vm69_vm0, %v41_v13, 0.0  ;;  %v43_v22 = vcombine.high %v41_v13, %v41_v13  ;;  %s613_s6 = scalar_lea.vmem %s561_s5, 128  ;;  %p618_p9 = scmp.lt.s32.totalorder %s561_s5, %s561_s5 }
  0x1e   :  { %v105_v21 = vsel %vm69_vm0, %v59_v15, 0.0  ;;  %v85_v24 = vrot.slane %v84_v20, 4  ;;  %v77_v27 = vsel %vm69_vm0, %v42_v18, 0.0  ;;  %v112_v29 = vsel %vm69_vm0, %v58_v19, 0.0  ;;  %p614_p8 = scmp.ne.s32.totalorder %s561_s5, %s613_s6  ;;  %p619_p10 = scmp.lt.s32.totalorder %s613_s6, %s613_s6 }
  0x1f   :  { %v72_v23 = vadd.f32 %v71_v16, %v70_v12  ;;  %v100_v25 = vadd.f32 %v99_v17, %v98_v14  ;;  %v106_v26 = vrot.slane %v105_v21, 4  ;;  %v91_v28 = vsel %vm69_vm0, %v43_v22, 0.0 }
  0x20   :  { %v60_v30 = vcombine.high %v58_v19, %v58_v19  ;;  %v86_v32 = vadd.f32 %v85_v24, %v84_v20  ;;  %v78_v35 = vrot.slane %v77_v27, 4  ;;  %v92_v36 = vrot.slane %v91_v28, 4  ;;  %p620_p11 = por %p619_p10, %p618_p9 }
  0x21   :  { %v73_v31 = vrot.slane %v72_v23, 2  ;;  %v101_v33 = vrot.slane %v100_v25, 2  ;;  %v107_v34 = vadd.f32 %v106_v26, %v105_v21  ;;  %v113_v37 = vrot.slane %v112_v29, 4 }
  0x22   :  { %v119_v38 = vsel %vm69_vm0, %v60_v30, 0.0  ;;  %v87_v40 = vrot.slane %v86_v32, 2  ;;  %v79_v43 = vadd.f32 %v78_v35, %v77_v27  ;;  %v93_v44 = vadd.f32 %v92_v36, %v91_v28  ;;  %p621_p12 = pnand %p620_p11, %p614_p8 }
  0x23   :  { %v74_v39 = vadd.f32 %v73_v31, %v72_v23  ;;  %v102_v41 = vadd.f32 %v101_v33, %v100_v25  ;;  %v108_v42 = vrot.slane %v107_v34, 2  ;;  %v120_v45 = vrot.slane %v119_v38, 4 }
  0x24   :  { %v88_v47 = vadd.f32 %v87_v40, %v86_v32  ;;  %v80_v50 = vrot.slane %v79_v43, 2  ;;  %v114_v51 = vadd.f32 %v113_v37, %v112_v29  ;;  %v94_v57 = vrot.slane %v93_v44, 2 }
  0x25   :  { %v75_v46 = vrot.slane %v74_v39, 1  ;;  %v103_v48 = vrot.slane %v102_v41, 1  ;;  %v109_v49 = vadd.f32 %v108_v42, %v107_v34  ;;  %v121_v61 = vadd.f32 %v120_v45, %v119_v38 }
  0x26   :  { %v89_v53 = vrot.slane %v88_v47, 1  ;;  %v81_v56 = vadd.f32 %v80_v50, %v79_v43  ;;  %v115_v1 = vrot.slane %v114_v51, 2  ;;  %v95_v6 = vadd.f32 %v94_v57, %v93_v44 }
  0x27   :  { %v76_v52 = vadd.f32 %v75_v46, %v74_v39  ;;  %v104_v54 = vadd.f32 %v103_v48, %v102_v41  ;;  %v110_v55 = vrot.slane %v109_v49, 1  ;;  %v122_v7 = vrot.slane %v121_v61, 2 }
  0x28   :  { %v90_v59 = vadd.f32 %v89_v53, %v88_v47  ;;  %v82_v62 = vrot.slane %v81_v56, 1  ;;  %v116_v8 = vadd.f32 %v115_v1, %v114_v51  ;;  %v96_v10 = vrot.slane %v95_v6, 1 }
  0x29   :  { %v126_v58 = vmul.f32 0.5, %v76_v52  ;;  %v111_v60 = vadd.f32 %v110_v55, %v109_v49  ;;  %v130_v0 = vmul.f32 0.5, %v104_v54  ;;  %v123_v11 = vadd.f32 %v122_v7, %v121_v61 }
  0x2a   :  { %v128_v63 = vmul.f32 0.5, %v90_v59  ;;  %v83_v4 = vadd.f32 %v82_v62, %v81_v56  ;;  %v117_v12 = vrot.slane %v116_v8, 1  ;;  %v97_v13 = vadd.f32 %v96_v10, %v95_v6 }
  0x2b   :  { %135 = vbcast.lane.b32.xlu0 %v126_v58, 256  ;;  %v131_v2 = vmul.f32 0.5, %v111_v60  ;;  %v124_v14 = vrot.slane %v123_v11, 1  ;;  %v643_v31 = vmov 1934713408   ;;  %vm552_vm0 = vcmask 261120  }
  0x2c   :  { %149 = vbcast.lane.b32.xlu1 %v128_v63, 256  ;;  %v127_v9 = vmul.f32 0.5, %v83_v4  ;;  %v118_v15 = vadd.f32 %v117_v12, %v116_v8  ;;  %v129_v16 = vmul.f32 0.5, %v97_v13  ;;  %v257_v32 = vunpack.c.l.s4 %v643_v31 }
  0x2d   :  { %v125_v17 = vadd.f32 %v124_v14, %v123_v11 }
  0x2e   :  { %v132_v18 = vmul.f32 0.5, %v118_v15  ;;  %v258_v40 = vunpack.c.0.s8 %v257_v32 }
  0x2f   :  { %163 = vbcast.lane.b32.xlu0 %v130_v0, 256  ;;  %v133_v19 = vmul.f32 0.5, %v125_v17 }
  0x30   :  { %170 = vbcast.lane.b32.xlu1 %v131_v2, 256  ;;  %v717_v54 = vsub.s32 %v258_v40, %v682_v3 }
  0x33   :  { %139 = vbcast.lane.b32.xlu0 %v126_v58, 264 }
  0x34   :  { %146 = vbcast.lane.b32.xlu1 %v127_v9, 264 }
  0x37   :  { %167 = vbcast.lane.b32.xlu0 %v130_v0, 264 }
  0x38   :  { %174 = vbcast.lane.b32.xlu1 %v131_v2, 264 }
  0x3b   :  { %142 = vbcast.lane.b32.xlu0 %v127_v9, 256 }
  0x3c   :  { %156 = vbcast.lane.b32.xlu1 %v129_v16, 256 }
  0x3f   :  { %177 = vbcast.lane.b32.xlu0 %v132_v18, 256 }
  0x40   :  { %184 = vbcast.lane.b32.xlu1 %v133_v19, 256 }
  0x43   :  { %153 = vbcast.lane.b32.xlu0 %v128_v63, 264 }
  0x44   :  { %160 = vbcast.lane.b32.xlu1 %v129_v16, 264 }
  0x47   :  { %181 = vbcast.lane.b32.xlu0 %v132_v18, 264 }
  0x48   :  { %188 = vbcast.lane.b32.xlu1 %v133_v19, 264 }
  0x9d   :  { %v136_v20 = vpop.permute.xlu0 %135 }
  0x9e   :  { %v150_v21 = vpop.permute.xlu1 %149 }
  0x9f   :  { %v190_v34 = vcombine.low %v136_v20, %v150_v21  ;;  %v191_v41 = vcombine.high %v136_v20, %v150_v21 }
  0xa1   :  { %v164_v22 = vpop.permute.xlu0 %163  ;;  %v198_v45 = vrot.slane %v190_v34, %v685_v5  ;;  %v205_v55 = vrot.slane %v191_v41, %v685_v5 }
  0xa2   :  { %v171_v23 = vpop.permute.xlu1 %170 }
  0xa5   :  { %v699_v24 = vpop.permute.xlu0 %139 }
  0xa6   :  { %v701_v25 = vpop.permute.xlu1 %146 }
  0xa9   :  { %v703_v26 = vpop.permute.xlu0 %167 }
  0xaa   :  { %v705_v27 = vpop.permute.xlu1 %174 }
  0xad   :  { %v143_v28 = vpop.permute.xlu0 %142 }
  0xae   :  { %v157_v29 = vpop.permute.xlu1 %156 }
  0xaf   :  { %v206_v30 = vcombine.low %v143_v28, %v157_v29  ;;  %v207_v35 = vcombine.high %v143_v28, %v157_v29 }
  0xb1   :  { %v178_v33 = vpop.permute.xlu0 %177  ;;  %v214_v38 = vrot.slane %v206_v30, %v685_v5  ;;  %v221_v46 = vrot.slane %v207_v35, %v685_v5 }
  0xb2   :  { %v222_v36 = vcombine.low %v164_v22, %v178_v33  ;;  %v185_v37 = vpop.permute.xlu1 %184  ;;  %v223_v39 = vcombine.high %v164_v22, %v178_v33 }
  0xb3   :  { %v238_v42 = vcombine.low %v171_v23, %v185_v37  ;;  %v239_v43 = vcombine.high %v171_v23, %v185_v37  ;;  %v254_v51 = vcombine.low %v198_v45, %v214_v38  ;;  %v255_v52 = vcombine.high %v198_v45, %v214_v38 }
  0xb4   :  { %v230_v47 = vrot.slane %v222_v36, %v685_v5  ;;  %v237_v53 = vrot.slane %v223_v39, %v685_v5  ;;  %v270_v63 = vcombine.low %v205_v55, %v221_v46  ;;  %v271_v11 = vcombine.high %v205_v55, %v221_v46 }
  0xb5   :  { %v708_v44 = vpop.permute.xlu0 %153  ;;  %v246_v48 = vrot.slane %v238_v42, %v685_v5  ;;  %v253_v49 = vrot.slane %v239_v43, %v685_v5  ;;  %v269_v3 = vrot.slane %v255_v52, %v717_v54  ;;  %v728_v2 = vrot.slane %v254_v51, %v717_v54 }
  0xb6   :  { %v161_v50 = vpop.permute.xlu1 %160  ;;  %v326_v6 = vcombine.low %v699_v24, %v708_v44  ;;  %v278_v15 = vrot.slane %v270_v63, %v717_v54  ;;  %v285_v30 = vrot.slane %v271_v11, %v717_v54 }
  0xb7   :  { %v286_v56 = vcombine.low %v230_v47, %v246_v48  ;;  %v287_v57 = vcombine.high %v230_v47, %v246_v48  ;;  %v302_v59 = vcombine.low %v237_v53, %v253_v49  ;;  %v342_v0 = vcombine.low %v701_v25, %v161_v50 }
  0xb8   :  { %v303_v4 = vcombine.high %v237_v53, %v253_v49  ;;  %v334_v16 = vrot.slane %v326_v6, %v685_v5  ;;  %v343_v23 = vcombine.high %v701_v25, %v161_v50 }
  0xb9   :  { %v182_v58 = vpop.permute.xlu0 %181  ;;  %v301_v61 = vrot.slane %v287_v57, %v717_v54  ;;  %v722_v62 = vrot.slane %v286_v56, %v717_v54  ;;  %v310_v10 = vrot.slane %v302_v59, %v717_v54  ;;  %v350_v13 = vrot.slane %v342_v0, %v685_v5 }
  0xba   :  { %v189_v60 = vpop.permute.xlu1 %188  ;;  %v358_v1 = vcombine.low %v703_v26, %v182_v58  ;;  %v317_v18 = vrot.slane %v303_v4, %v717_v54  ;;  %v359_v29 = vcombine.high %v703_v26, %v182_v58  ;;  %v357_v25 = vrot.slane %v343_v23, %v685_v5 }
  0xbb   :  { %v374_v7 = vcombine.low %v705_v27, %v189_v60  ;;  %v320_v8 = vcombine.low %v269_v3, %v301_v61  ;;  %v319_v9 = vcombine.high %v728_v2, %v722_v62  ;;  %v375_v17 = vcombine.high %v705_v27, %v189_v60 }
  0xbc   :  { %v366_v14 = vrot.slane %v358_v1, %v685_v5  ;;  %v322_v20 = vcombine.low %v278_v15, %v310_v10  ;;  %v321_v21 = vcombine.high %v269_v3, %v301_v61  ;;  %v318_v22 = vcombine.low %v728_v2, %v722_v62 }
  0xbd   :  { %v382_v12 = vrot.slane %v374_v7, %v685_v5  ;;  %467 = vrot.lane.b32.xlu1 %v320_v8, %s644_s0  ;;  %463 = vrot.lane.b32.xlu0 %v319_v9, %s645_s20  ;;  %v390_v28 = vcombine.low %v334_v16, %v350_v13  ;;  %v327_v27 = vcombine.high %v699_v24, %v708_v44 }
  0xbe   :  { %v389_v31 = vrot.slane %v375_v17, %v685_v5  ;;  %v324_v33 = vcombine.low %v285_v30, %v317_v18  ;;  %v323_v34 = vcombine.high %v278_v15, %v310_v10  ;;  %v391_v36 = vcombine.high %v334_v16, %v350_v13 }
  0xbf   :  { %v422_v19 = vcombine.low %v366_v14, %v382_v12  ;;  %v423_v32 = vcombine.high %v366_v14, %v382_v12  ;;  %v373_v26 = vrot.slane %v359_v29, %v685_v5  ;;  %v398_v37 = vrot.slane %v390_v28, %v717_v54 }
  0xc0   :  { %v341_v24 = vrot.slane %v327_v27, %v685_v5  ;;  %v325_v39 = vcombine.high %v285_v30, %v317_v18  ;;  %v405_v43 = vrot.slane %v391_v36, %v717_v54 }
  0xc1   :  { %475 = vrot.lane.b32.xlu1 %v322_v20, %s641_s17  ;;  %471 = vrot.lane.b32.xlu0 %v321_v21, %s646_s21  ;;  %v430_v35 = vrot.slane %v422_v19, %v717_v54  ;;  %v438_v38 = vcombine.low %v373_v26, %v389_v31  ;;  %v437_v41 = vrot.slane %v423_v32, %v717_v54 }
  0xc2   :  { %v406_v42 = vcombine.low %v341_v24, %v357_v25  ;;  %v439_v44 = vcombine.high %v373_v26, %v389_v31  ;;  %v407_v48 = vcombine.high %v341_v24, %v357_v25 }
  0xc3   :  { %v454_v40 = vcombine.low %v398_v37, %v430_v35  ;;  %v455_v45 = vcombine.high %v398_v37, %v430_v35  ;;  %v456_v46 = vcombine.low %v405_v43, %v437_v41  ;;  %v446_v47 = vrot.slane %v438_v38, %v717_v54 }
  0xc4   :  { %v414_v5 = vrot.slane %v406_v42, %v717_v54  ;;  %v457_v49 = vcombine.high %v405_v43, %v437_v41  ;;  %v453_v51 = vrot.slane %v439_v44, %v717_v54  ;;  %v421_v52 = vrot.slane %v407_v48, %v717_v54 }
  0xc5   :  { %483 = vrot.lane.b32.xlu1 %v324_v33, %s647_s22  ;;  %479 = vrot.lane.b32.xlu0 %v323_v34, %s648_s23 }
  0xc6   :  { %v458_v50 = vcombine.low %v414_v5, %v446_v47  ;;  %v459_v53 = vcombine.high %v414_v5, %v446_v47  ;;  %v460_v55 = vcombine.low %v421_v52, %v453_v51  ;;  %v461_v56 = vcombine.high %v421_v52, %v453_v51 }
  0xc9   :  { %487 = vrot.lane.b32.xlu0 %v325_v39, %s649_s24  ;;  %491 = vrot.lane.b32.xlu1 %v454_v40, %s650_s25 }
  0xcd   :  { %495 = vrot.lane.b32.xlu0 %v455_v45, %s651_s26  ;;  %499 = vrot.lane.b32.xlu1 %v456_v46, %s652_s27 }
  0xd1   :  { %503 = vrot.lane.b32.xlu0 %v457_v49, %s653_s28  ;;  %507 = vrot.lane.b32.xlu1 %v458_v50, %s654_s29 }
  0xd5   :  { %511 = vrot.lane.b32.xlu0 %v459_v53, %s655_s30  ;;  %515 = vrot.lane.b32.xlu1 %v460_v55, %s656_s2 }
  0xd9   :  { %519 = vrot.lane.b32.xlu0 %v461_v56, %s657_s3 }
 0x12f   :  { %v464_v57 = vpop.permute.xlu0 %463  ;;  %v468_v58 = vpop.permute.xlu1 %467 }
 0x130   :  { %v523_v59 = vsel %vm522_vm1, %v318_v22, %v464_v57 }
 0x131   :  { %v525_v60 = vsel %vm524_vm2, %v523_v59, %v468_v58 }
 0x133   :  { %v472_v54 = vpop.permute.xlu0 %471  ;;  %v476_v61 = vpop.permute.xlu1 %475 }
 0x134   :  { %v527_v63 = vsel %vm526_vm3, %v525_v60, %v472_v54 }
 0x135   :  { %v529_v0 = vsel %vm528_vm4, %v527_v63, %v476_v61 }
 0x137   :  { %v480_v1 = vpop.permute.xlu0 %479  ;;  %v484_v3 = vpop.permute.xlu1 %483 }
 0x138   :  { %v531_v4 = vsel %vm530_vm5, %v529_v0, %v480_v1 }
 0x139   :  { %v533_v6 = vsel %vm532_vm6, %v531_v4, %v484_v3 }
 0x13b   :  { %v488_v7 = vpop.permute.xlu0 %487  ;;  %v492_v8 = vpop.permute.xlu1 %491 }
 0x13c   :  { %v535_v9 = vsel %vm534_vm7, %v533_v6, %v488_v7 }
 0x13d   :  { %v537_v62 = vsel %vm536_vm8, %v535_v9, %v492_v8 }
 0x13f   :  { %v496_v2 = vpop.permute.xlu0 %495  ;;  %v500_v10 = vpop.permute.xlu1 %499 }
 0x140   :  { %v539_v11 = vsel %vm538_vm9, %v537_v62, %v496_v2 }
 0x141   :  { %v541_v12 = vsel %vm540_vm10, %v539_v11, %v500_v10 }
 0x143   :  { %v504_v13 = vpop.permute.xlu0 %503  ;;  %v508_v14 = vpop.permute.xlu1 %507 }
 0x144   :  { %v543_v15 = vsel %vm542_vm11, %v541_v12, %v504_v13 }
 0x145   :  { %v545_v16 = vsel %vm544_vm12, %v543_v15, %v508_v14 }
 0x147   :  { %v512_v17 = vpop.permute.xlu0 %511  ;;  %v516_v19 = vpop.permute.xlu1 %515 }
 0x148   :  { %v547_v18 = vsel %vm546_vm13, %v545_v16, %v512_v17 }
 0x149   :  { %v549_v20 = vsel %vm548_vm14, %v547_v18, %v516_v19 }
 0x14b   :  { %v520_v21 = vpop.permute.xlu0 %519 }
 0x14c   :  { %v551_v22 = vsel %vm550_vm15, %v549_v20, %v520_v21 }
 0x14d   :  { %553 = vst.msk [vmem:[#allocation5] sm:$0xff] %vm552_vm0, %v551_v22 }
 0x14e   :  { %624 = shalt.err (!%p621_p12)
}
 0x14f   :  { %s625_s9 = scalar_lea.hbm %s779_s1, 128 }
 0x150   :  { %p626_p13 = scmp.ne.s32.totalorder %s779_s1, %s625_s9  ;;  %p629_p0 = scmp.lt.u32.totalorder %s625_s9, %s779_s1 }
 0x152   :  { %p631_p1 = pnand %p629_p0, %p626_p13 }
 0x154   :  { %634 = shalt.err (!%p631_p1)
}
 0x155   :  { %563 = dma.vmem_to_hbm [thread:$0]  %s561_s5, 128, %s779_s1, [#allocation4]  }
 0x156   :  { %637 = dma.done.wait [#allocation4], 128  }
 0x157   :  { %638 = vsyncadd [#allocation4], 4294967168 }
 0x158   :  { %567 = vsyncpa [#allocation3], 1 }
 0x159   :  { %568 = vsyncpa [#allocation4], 1 }

</bundles_post_ra>
